<compile_context>
chip_gen: v7x
topology: tpu7x:2x2x1
jax: 0.10.0
libtpu: 0.0.40
codegen_flags: <defaults>
</compile_context>

<pallas_src>
import functools

import jax
import jax.numpy as jnp
from jax.experimental import pallas as pl
from jax.experimental.pallas import tpu as pltpu

LANES = 128
SUBLANES = 8
MAX_BLOCK_ROWS = 1024   # (1024, 128) f32 block = 512 KiB per input per buffer


def _charbonnier_partial_kernel(x_ref, y_ref, out_ref, *, eps):
    """Accumulate sum(sqrt((x - y)^2 + eps^2)) over this block into the
    resident (1, 8, 128) partial-sum output block for this core."""
    i = pl.program_id(1)  # reduction axis (innermost)

    @pl.when(i == 0)
    def _init():
        out_ref[...] = jnp.zeros_like(out_ref)

    x = x_ref[...].astype(jnp.float32)
    y = y_ref[...].astype(jnp.float32)
    d = x - y
    val = jnp.sqrt(d * d + jnp.float32(eps * eps))

    # Fold (block_rows, 128) onto one (8, 128) vreg using VPU adds only; the
    # cross-lane/sublane reduce to a scalar is deferred to the wrapper.
    r = val.shape[0] // SUBLANES
    partial = jnp.sum(val.reshape(r, SUBLANES, LANES), axis=0)
    out_ref[...] += partial.reshape(1, SUBLANES, LANES)


def charbonnier_loss(x, y, eps=1e-3):
    """mean(sqrt((x - y)^2 + eps^2)) computed with a Pallas TPU kernel."""
    assert x.shape == y.shape
    eps = float(eps)
    n = int(x.size)
    eps2 = jnp.float32(eps) * jnp.float32(eps)

    xf = x.reshape(-1)   # reshape of a contiguous array: no HBM pass
    yf = y.reshape(-1)

    rows_total = n // LANES
    block_rows = min(MAX_BLOCK_ROWS, (rows_total // SUBLANES) * SUBLANES)

    if block_rows == 0:
        # Tiny input (< 1024 elements): plain JAX, no kernel needed.
        d = xf.astype(jnp.float32) - yf.astype(jnp.float32)
        return jnp.sum(jnp.sqrt(d * d + eps2)) / jnp.float32(n)

    block_elems = block_rows * LANES
    num_blocks = n // block_elems          # whole blocks handled by the kernel
    n_main = num_blocks * block_elems
    rows_main = n_main // LANES

    if n_main == n:
        x_main = xf.reshape(rows_main, LANES)
        y_main = yf.reshape(rows_main, LANES)
    else:
        x_main = jax.lax.slice(xf, (0,), (n_main,)).reshape(rows_main, LANES)
        y_main = jax.lax.slice(yf, (0,), (n_main,)).reshape(rows_main, LANES)

    # Megacore split (v7x): only when the blocks divide evenly between 2 cores,
    # keeping the index math trivial.  Neutral on single-TC chips.
    num_cores = 2 if (num_blocks >= 2 and num_blocks % 2 == 0) else 1
    nb_per_core = num_blocks // num_cores

    kernel = functools.partial(_charbonnier_partial_kernel, eps=eps)

    partials = pl.pallas_call(
        kernel,
        out_shape=jax.ShapeDtypeStruct((num_cores, SUBLANES, LANES), jnp.float32),
        grid_spec=pltpu.PrefetchScalarGridSpec(
            num_scalar_prefetch=0,
            grid=(num_cores, nb_per_core),
            in_specs=[
                pl.BlockSpec((block_rows, LANES),
                             lambda c, i: (c * nb_per_core + i, 0)),
                pl.BlockSpec((block_rows, LANES),
                             lambda c, i: (c * nb_per_core + i, 0)),
            ],
            out_specs=pl.BlockSpec((1, SUBLANES, LANES),
                                   lambda c, i: (c, 0, 0)),
        ),
        compiler_params=pltpu.CompilerParams(
            dimension_semantics=("parallel", "arbitrary"),
        ),
    )(x_main, y_main)

    total = jnp.sum(partials)

    # Ragged tail (< one block) reduced in plain JAX — negligible work, and it
    # keeps the kernel mask-free.
    if n_main != n:
        xt = jax.lax.slice(xf, (n_main,), (n,)).astype(jnp.float32)
        yt = jax.lax.slice(yf, (n_main,), (n,)).astype(jnp.float32)
        dt = xt - yt
        total = total + jnp.sum(jnp.sqrt(dt * dt + eps2))

    return total / jnp.float32(n)


if __name__ == "__main__":
    key = jax.random.PRNGKey(0)
    kx, ky = jax.random.split(key)
    # NCHW, small shapes: batch=2, channels=4, spatial=16x16
    x = jax.random.normal(kx, (2, 4, 16, 16), dtype=jnp.float32)
    y = jax.random.normal(ky, (2, 4, 16, 16), dtype=jnp.float32)

    eps = 1e-3
    loss = jax.block_until_ready(charbonnier_loss(x, y, eps=eps))

    # Reference in plain JAX
    d = x - y
    ref = jnp.mean(jnp.sqrt(d * d + eps * eps))

    assert jnp.allclose(loss, ref, rtol=1e-5, atol=1e-6), (loss, ref)
    print("KERNEL_OK")
</pallas_src>

<mosaic_0001>
module attributes {stable_mosaic.version = 11 : i64} {
  func.func @_charbonnier_partial_kernel(%arg0: i32, %arg1: i32, %arg2: memref<16x128xf32, #tpu.memory_space<vmem>>, %arg3: memref<16x128xf32, #tpu.memory_space<vmem>>, %arg4: memref<1x8x128xf32, #tpu.memory_space<vmem>>) attributes {dimension_semantics = [#tpu.dimension_semantics<parallel>, #tpu.dimension_semantics<arbitrary>], iteration_bounds = array<i64: 1, 1>, scalar_prefetch = 0 : i64, scratch_operands = 0 : i64, tpu.core_type = #tpu.core_type<tc>, window_params = [{transform_indices = @transform_0, window_bounds = array<i64: 16, 128>}, {transform_indices = @transform_1, window_bounds = array<i64: 16, 128>}, {transform_indices = @transform_2, window_bounds = array<i64: 1, 8, 128>}]} {
    %c0_i32 = arith.constant 0 : i32
    %0 = arith.cmpi eq, %arg1, %c0_i32 : i32
    %1 = arith.extui %0 : i1 to i32
    %c0_i32_0 = arith.constant 0 : i32
    %2 = arith.cmpi ne, %1, %c0_i32_0 : i32
    scf.if %2 {
      %cst_11 = arith.constant 0.000000e+00 : f32
      %16 = vector.broadcast %cst_11 : f32 to vector<1x8x128xf32>
      %c0_12 = arith.constant 0 : index
      %c0_13 = arith.constant 0 : index
      %c0_14 = arith.constant 0 : index
      %17 = vector.load %arg4[%c0_12, %c0_13, %c0_14] : memref<1x8x128xf32, #tpu.memory_space<vmem>>, vector<1x8x128xf32>
      tpu.vector_store %arg4[%c0_12, %c0_13, %c0_14], %16 {strides = array<i32>} : memref<1x8x128xf32, #tpu.memory_space<vmem>>, vector<1x8x128xf32>,
    } else {
    }
    %c0 = arith.constant 0 : index
    %c0_1 = arith.constant 0 : index
    %3 = vector.load %arg2[%c0, %c0_1] : memref<16x128xf32, #tpu.memory_space<vmem>>, vector<16x128xf32>
    %c0_2 = arith.constant 0 : index
    %c0_3 = arith.constant 0 : index
    %4 = vector.load %arg3[%c0_2, %c0_3] : memref<16x128xf32, #tpu.memory_space<vmem>>, vector<16x128xf32>
    %5 = arith.subf %3, %4 : vector<16x128xf32>
    %6 = arith.mulf %5, %5 : vector<16x128xf32>
    %cst = arith.constant 9.99999997E-7 : f32
    %7 = vector.broadcast %cst : f32 to vector<16x128xf32>
    %8 = arith.addf %6, %7 : vector<16x128xf32>
    %9 = math.sqrt %8 : vector<16x128xf32>
    %10 = vector.shape_cast %9 : vector<16x128xf32> to vector<2x8x128xf32>
    %cst_4 = arith.constant dense<0.000000e+00> : vector<8x128xf32>
    %11 = vector.multi_reduction <add>, %10, %cst_4 [0] : vector<2x8x128xf32> to vector<8x128xf32>
    %c0_5 = arith.constant 0 : index
    %c0_6 = arith.constant 0 : index
    %c0_7 = arith.constant 0 : index
    %12 = vector.load %arg4[%c0_5, %c0_6, %c0_7] : memref<1x8x128xf32, #tpu.memory_space<vmem>>, vector<1x8x128xf32>
    %13 = vector.shape_cast %11 : vector<8x128xf32> to vector<1x8x128xf32>
    %14 = arith.addf %12, %13 : vector<1x8x128xf32>
    %c0_8 = arith.constant 0 : index
    %c0_9 = arith.constant 0 : index
    %c0_10 = arith.constant 0 : index
    %15 = vector.load %arg4[%c0_8, %c0_9, %c0_10] : memref<1x8x128xf32, #tpu.memory_space<vmem>>, vector<1x8x128xf32>
    tpu.vector_store %arg4[%c0_8, %c0_9, %c0_10], %14 {strides = array<i32>} : memref<1x8x128xf32, #tpu.memory_space<vmem>>, vector<1x8x128xf32>,
    return
  }
  func.func @transform_0(%arg0: i32, %arg1: i32) -> (i32, i32) {
    %c1_i32 = arith.constant 1 : i32
    %0 = arith.muli %arg0, %c1_i32 : i32
    %1 = arith.addi %0, %arg1 : i32
    %c0_i32 = arith.constant 0 : i32
    %c0_i32_0 = arith.constant 0 : i32
    return %1, %c0_i32 : i32, i32
  }
  func.func @transform_1(%arg0: i32, %arg1: i32) -> (i32, i32) {
    %c1_i32 = arith.constant 1 : i32
    %0 = arith.muli %arg0, %c1_i32 : i32
    %1 = arith.addi %0, %arg1 : i32
    %c0_i32 = arith.constant 0 : i32
    %c0_i32_0 = arith.constant 0 : i32
    return %1, %c0_i32 : i32, i32
  }
  func.func @transform_2(%arg0: i32, %arg1: i32) -> (i32, i32, i32) {
    %c0_i32 = arith.constant 0 : i32
    %c0_i32_0 = arith.constant 0 : i32
    %c0_i32_1 = arith.constant 0 : i32
    return %arg0, %c0_i32, %c0_i32_0 : i32, i32, i32
  }
}

</mosaic_0001>

<bundles_post_ra>
// kernel: tpu_custom_call.1
= control target key start
LH: loop header
LB: loop body
LE: loop exit
PB: predicated region body
PF: predicated region fallthrough
CT: control target
= control target key end

     0   :  { %7 = vsyncpa [#allocation3], 0  ;;  %s239_s0 = inlined_call_operand.hbm [shape: f32[16,128], index: 0, kind: input, shape index: {}]   ;;  %s240_s1 = inlined_call_operand.hbm [shape: f32[16,128], index: 1, kind: input, shape index: {}]   ;;  %s241_s2 = inlined_call_operand.hbm [shape: f32[1,8,128], index: 2, kind: output, shape index: {}]  }
   0x1   :  { %8 = vsyncpa [#allocation6], 0 }
   0x2   :  { %9 = vsyncpa [#allocation4], 0  ;;  %s183_s9 = smov [#allocation2]   ;;  %s111_s13 = scalar_lea.hbm %s239_s0, 256 }
   0x3   :  { %s19_s10 = sshll.u32 %s183_s9, 4  ;;  %p112_p0 = scmp.ne.s32.totalorder %s239_s0, %s111_s13  ;;  %s20_s10 = int_to_ptr.vmem [resolvable:$true] %s19_s10 }
   0x4   :  { %p115_p1 = scmp.lt.u32.totalorder %s111_s13, %s239_s0 }
   0x6   :  { %p117_p2 = pnand %p115_p1, %p112_p0 }
   0x8   :  { %120 = shalt.err (!%p117_p2)
}
   0x9   :  { %s121_s18 = scalar_lea.vmem %s20_s10, 256  ;;  %p126_p4 = scmp.lt.s32.totalorder %s20_s10, %s20_s10 }
   0xa   :  { %p122_p3 = scmp.ne.s32.totalorder %s20_s10, %s121_s18  ;;  %p127_p5 = scmp.lt.s32.totalorder %s121_s18, %s121_s18 }
   0xc   :  { %p128_p6 = por %p127_p5, %p126_p4 }
   0xe   :  { %p129_p7 = pnand %p128_p6, %p122_p3 }
  0x10   :  { %132 = shalt.err (!%p129_p7)
}
  0x11   :  { %s184_s19 = smov 128   ;;  %s185_s20 = smov 8  }
  0x12   :  { %25 = dma.hbm_to_vmem [thread:$0]  %s239_s0, 256, %s20_s10, [#allocation3], %s184_s19, %s184_s19, %s185_s20  }
  0x13   :  { %s186_s23 = smov [#allocation5]   ;;  %s133_s27 = scalar_lea.hbm %s240_s1, 256 }
  0x14   :  { %s35_s24 = sshll.u32 %s186_s23, 4  ;;  %p134_p8 = scmp.ne.s32.totalorder %s240_s1, %s133_s27  ;;  %s36_s24 = int_to_ptr.vmem [resolvable:$true] %s35_s24 }
  0x15   :  { %p137_p9 = scmp.lt.u32.totalorder %s133_s27, %s240_s1 }
  0x17   :  { %p139_p10 = pnand %p137_p9, %p134_p8 }
  0x19   :  { %142 = shalt.err (!%p139_p10)
}
  0x1a   :  { %s143_s4 = scalar_lea.vmem %s36_s24, 256  ;;  %p148_p12 = scmp.lt.s32.totalorder %s36_s24, %s36_s24 }
  0x1b   :  { %p144_p11 = scmp.ne.s32.totalorder %s36_s24, %s143_s4  ;;  %p149_p13 = scmp.lt.s32.totalorder %s143_s4, %s143_s4 }
  0x1d   :  { %p150_p0 = por %p149_p13, %p148_p12 }
  0x1f   :  { %p151_p1 = pnand %p150_p0, %p144_p11 }
  0x21   :  { %154 = shalt.err (!%p151_p1)
}
  0x22   :  { %41 = dma.hbm_to_vmem [thread:$0]  %s240_s1, 256, %s36_s24, [#allocation6], %s184_s19, %s184_s19, %s185_s20  }
  0x23   :  { %177 = dma.done.wait [#allocation3], 256  }
  0x24   :  { %178 = vsyncadd [#allocation3], 4294967040 }
  0x25   :  { %179 = dma.done.wait [#allocation6], 256  }
  0x26   :  { %180 = vsyncadd [#allocation6], 4294967040  ;;  %v57_v0 = vld [vmem:[#allocation2] sm:$0xff]  ;;  %v58_v1 = vld [vmem:[#allocation2 + $0x8] sm:$0xff]  ;;  %s187_s1 = smov [#allocation7]  }
  0x27   :  { %v59_v2 = vld [vmem:[#allocation5] sm:$0xff]  ;;  %v60_v3 = vld [vmem:[#allocation5 + $0x8] sm:$0xff]  ;;  %s91_s6 = sshll.u32 %s187_s1, 4  ;;  %s92_s6 = int_to_ptr.vmem [resolvable:$true] %s91_s6 }
  0x28   :  { %v61_v4 = vsub.f32 %v57_v0, %v59_v2  ;;  %v62_v5 = vsub.f32 %v58_v1, %v60_v3  ;;  %s155_s7 = scalar_lea.vmem %s92_s6, 128  ;;  %p160_p3 = scmp.lt.s32.totalorder %s92_s6, %s92_s6 }
  0x29   :  { %p156_p2 = scmp.ne.s32.totalorder %s92_s6, %s155_s7  ;;  %p161_p4 = scmp.lt.s32.totalorder %s155_s7, %s155_s7 }
  0x2a   :  { %v63_v6 = vmul.f32 %v61_v4, %v61_v4  ;;  %v64_v7 = vmul.f32 %v62_v5, %v62_v5 }
  0x2b   :  { %p162_p5 = por %p161_p4, %p160_p3 }
  0x2c   :  { %v65_v8 = vadd.f32 1e-06, %v63_v6  ;;  %v66_v9 = vadd.f32 1e-06, %v64_v7 }
  0x2d   :  { %p163_p6 = pnand %p162_p5, %p156_p2 }
  0x2e   :  { %107 = vrsqrt.f32 %v65_v8  ;;  %vm69_vm0 = vcmp.eq.f32.partialorder %v65_v8, inf  ;;  %v72_v11 = vand.u32 2147483648, %v65_v8  ;;  %vm71_vm1 = vcmp.eq.f32.partialorder %v65_v8, 0.0 }
  0x2f   :  { %109 = vrsqrt.f32 %v66_v9  ;;  %vm76_vm2 = vcmp.eq.f32.partialorder %v66_v9, inf  ;;  %v79_v14 = vand.u32 2147483648, %v66_v9  ;;  %vm78_vm3 = vcmp.eq.f32.partialorder %v66_v9, 0.0 }
  0x38   :  { %v108_v10 = vpop.eup %107 }
  0x39   :  { %v110_v12 = vpop.eup %109  ;;  %v68_v13 = vmul.f32 %v108_v10, %v65_v8 }
  0x3a   :  { %v75_v15 = vmul.f32 %v110_v12, %v66_v9 }
  0x3b   :  { %v70_v16 = vsel %vm69_vm0, %v65_v8, %v68_v13 }
  0x3c   :  { %v73_v17 = vsel %vm71_vm1, %v72_v11, %v70_v16  ;;  %v77_v18 = vsel %vm76_vm2, %v66_v9, %v75_v15 }
  0x3d   :  { %v80_v19 = vsel %vm78_vm3, %v79_v14, %v77_v18 }
  0x3e   :  { %v81_v20 = vadd.f32 %v80_v19, %v73_v17 }
  0x40   :  { %84 = vst [vmem:[#allocation7] sm:$0xff] %v81_v20 }
  0x41   :  { %166 = shalt.err (!%p163_p6)
}
  0x42   :  { %s167_s10 = scalar_lea.hbm %s241_s2, 128 }
  0x43   :  { %p168_p7 = scmp.ne.s32.totalorder %s241_s2, %s167_s10  ;;  %p171_p8 = scmp.lt.u32.totalorder %s167_s10, %s241_s2 }
  0x45   :  { %p173_p9 = pnand %p171_p8, %p168_p7 }
  0x47   :  { %176 = shalt.err (!%p173_p9)
}
  0x48   :  { %94 = dma.vmem_to_hbm [thread:$0]  %s92_s6, 128, %s241_s2, [#allocation4]  }
  0x49   :  { %181 = dma.done.wait [#allocation4], 128  }
  0x4a   :  { %182 = vsyncadd [#allocation4], 4294967168 }
  0x4b   :  { %98 = vsyncpa [#allocation3], 1 }
  0x4c   :  { %99 = vsyncpa [#allocation6], 1 }
  0x4d   :  { %100 = vsyncpa [#allocation4], 1 }

</bundles_post_ra>
